<compile_context>
chip_gen: v5e
topology: v5e:2x2
jax: 0.10.0
libtpu: 0.0.40
codegen_flags: <defaults>
</compile_context>

<pallas_src>
import math

import jax
import jax.numpy as jnp
from jax import lax
from jax.experimental import pallas as pl
from jax.experimental.pallas import tpu as pltpu

_LANES = 128
_TILE_ELEM_BUDGET = 1 << 20      # ~1M elements (~4 MiB f32) per pipelined block
_VMEM_CEILING = 48 << 20         # stay under v7x's 64 MiB physical VMEM; ample on v5e/v6e
_SMALL_BATCH = 4                 # below this, stream a precomputed table instead


def _is_pow2(n):
    return n > 0 and (n & (n - 1)) == 0


def _enc_dtype(x_dtype):
    # bf16 VALUs on v6e/v7x: keep the table in bf16 when x is bf16; f32 otherwise
    # (v5e has no bf16 VALU, and f32 x stays fully f32).
    return jnp.bfloat16 if x_dtype == jnp.bfloat16 else jnp.float32


def _pick_rows_tile(n_rows, cols, itemsize):
    """Second-minor tile size: as large as the element budget allows, aligned to the
    dtype's sublane packing, split into >= 2 tiles when possible (v7x megacore)."""
    align = 8 * max(1, 4 // itemsize)            # f32: 8, bf16: 16, int8/fp8: 32
    ts = min(n_rows, max(align, _TILE_ELEM_BUDGET // max(cols, 1)))
    if ts < n_rows:
        ts = max(align, (ts // align) * align)
    # Ensure the "parallel" sequence axis has >= 2 tiles so both v7x TCs get work.
    if pl.cdiv(n_rows, ts) == 1 and n_rows > align:
        half = pl.cdiv(n_rows, 2)
        ts_half = max(align, pl.cdiv(half, align) * align)
        if ts_half < n_rows:
            ts = ts_half
    return ts


def _make_compute_kernel(model_dim, cols, folded):
    """In-kernel table build, cached in VMEM scratch across the (innermost) batch axis."""
    neg_ln_base_over_dim = -math.log(10000.0) / model_dim
    shift = int(round(math.log2(model_dim))) if folded else 0

    def kernel(x_ref, o_ref, enc_ref):
        # NOTE: grid indices must be read OUTSIDE any pl.when body (program_id inside a
        # nested cond is not supported by the interpreter); capture them instead.
        s_idx = pl.program_id(0)
        b_idx = pl.program_id(1)
        rows = enc_ref.shape[0]

        # Grid is (s_tile, batch) with batch INNERMOST and marked "arbitrary": build the
        # encoding for this sequence tile once (b == 0) and reuse it for all batch steps.
        # Do NOT mark the batch axis "parallel" -- the cache would go stale.
        @pl.when(b_idx == 0)
        def _():
            row = lax.broadcasted_iota(jnp.int32, (rows, cols), 0)
            lane = lax.broadcasted_iota(jnp.int32, (rows, cols), 1)
            if folded:
                # Power-of-two D folded into 128-lane rows: shifts/masks only.
                flat = s_idx * (rows * cols) + row * cols + lane
                pos = flat >> shift
                d = flat & (model_dim - 1)
            else:
                pos = s_idx * rows + row
                d = lane
            # 10000 ** (-(2*(d//2)) / D)  ==  exp((d & -2) * (-ln(10000)/D))   (EUP exp)
            inv_freq = jnp.exp((d & -2).astype(jnp.float32) * neg_ln_base_over_dim)
            angle = pos.astype(jnp.float32) * inv_freq
            # Odd dims: cos(x) == sin(x + pi/2) -> one transcendental per element.
            angle = angle + jnp.where((d & 1) == 1,
                                      jnp.float32(0.5 * math.pi), jnp.float32(0.0))
            enc_ref[...] = jnp.sin(angle).astype(enc_ref.dtype)

        xv = x_ref[...]
        ev = enc_ref[...]
        if xv.dtype == ev.dtype:
            o_ref[...] = xv + ev
        else:
            o_ref[...] = (xv.astype(jnp.float32) + ev.astype(jnp.float32)).astype(o_ref.dtype)

    return kernel


def _add_kernel(x_ref, enc_ref, o_ref):
    """Streamed-table variant: pure elementwise add of a precomputed encoding block."""
    xv = x_ref[...]
    ev = enc_ref[...]
    if xv.dtype == ev.dtype:
        o_ref[...] = xv + ev
    else:
        o_ref[...] = (xv.astype(jnp.float32) + ev.astype(jnp.float32)).astype(o_ref.dtype)


def sinusoidal_positional_embedding(x, max_position_embeddings, model_dim):
    """x: (B, S, D).  Returns x + sinusoidal_encoding[:S][None, :, :]."""
    B, S, D = x.shape
    if S > max_position_embeddings:
        raise ValueError(
            "Input sequence length is greater than the maximum position embedding length")
    if D != model_dim:
        raise ValueError(
            "Input sequence dimension is different from the position embedding dimension")

    itemsize = jnp.dtype(x.dtype).itemsize
    enc_dtype = _enc_dtype(x.dtype)
    enc_itemsize = jnp.dtype(enc_dtype).itemsize

    lane_dense = (D % _LANES == 0)
    can_fold = (not lane_dense) and ((S * D) % _LANES == 0)
    pow2_fold = can_fold and _is_pow2(D) and D < _LANES

    # Small batches cannot amortize the in-kernel sin build (sin is a VALU polynomial,
    # not an EUP op); non-power-of-two folds would need vector div/mod.  Both cases
    # stream a precomputed table from HBM instead (lane-dense via the same fold).
    use_table = (B < _SMALL_BATCH) or not (lane_dense or pow2_fold)

    # Lane-dense view of the trailing (S, D) axes.
    if can_fold:
        n_rows, cols = (S * D) // _LANES, _LANES
    else:
        n_rows, cols = S, D
    x_view = x.reshape(B, n_rows, cols)

    ts = _pick_rows_tile(n_rows, cols, itemsize)
    n_s_tiles = pl.cdiv(n_rows, ts)
    block_bytes = ts * cols * itemsize

    if use_table:
        # Precompute encoding[:S] (same closed form as the kernel / PyTorch buffer).
        d = jnp.arange(D, dtype=jnp.int32)
        inv_freq = jnp.exp((d & -2).astype(jnp.float32) * (-math.log(10000.0) / D))
        pos = jnp.arange(S, dtype=jnp.float32)[:, None]
        angle = pos * inv_freq[None, :] + jnp.where(
            (d & 1) == 1, jnp.float32(0.5 * math.pi), jnp.float32(0.0))[None, :]
        enc = jnp.sin(angle).astype(enc_dtype).reshape(n_rows, cols)

        vmem_limit = int(min(_VMEM_CEILING,
                             max(8 << 20,
                                 4 * block_bytes + 2 * ts * cols * enc_itemsize + (4 << 20))))
        out = pl.pallas_call(
            _add_kernel,
            out_shape=jax.ShapeDtypeStruct(x_view.shape, x.dtype),
            grid_spec=pltpu.PrefetchScalarGridSpec(
                num_scalar_prefetch=0,
                grid=(n_s_tiles, B),
                in_specs=[pl.BlockSpec((None, ts, cols), lambda s, b: (b, s, 0)),
                          pl.BlockSpec((ts, cols), lambda s, b: (s, 0))],
                out_specs=pl.BlockSpec((None, ts, cols), lambda s, b: (b, s, 0)),
            ),
            compiler_params=pltpu.CompilerParams(
                # No cross-iteration state here: both axes may be megacore-sharded.
                dimension_semantics=("parallel", "parallel"),
                vmem_limit_bytes=vmem_limit,
            ),
        )(x_view, enc)
    else:
        vmem_limit = int(min(_VMEM_CEILING,
                             max(8 << 20,
                                 4 * block_bytes + ts * cols * enc_itemsize + (4 << 20))))
        out = pl.pallas_call(
            _make_compute_kernel(D, cols, pow2_fold),
            out_shape=jax.ShapeDtypeStruct(x_view.shape, x.dtype),
            grid_spec=pltpu.PrefetchScalarGridSpec(
                num_scalar_prefetch=0,
                grid=(n_s_tiles, B),               # sequence tiles outer, batch innermost
                in_specs=[pl.BlockSpec((None, ts, cols), lambda s, b: (b, s, 0))],
                out_specs=pl.BlockSpec((None, ts, cols), lambda s, b: (b, s, 0)),
                scratch_shapes=[pltpu.VMEM((ts, cols), enc_dtype)],   # cached encoding
            ),
            compiler_params=pltpu.CompilerParams(
                # Batch axis MUST stay "arbitrary": the enc cache is keyed on b == 0.
                dimension_semantics=("parallel", "arbitrary"),
                vmem_limit_bytes=vmem_limit,
            ),
        )(x_view)

    return out.reshape(B, S, D)


def _reference(x, max_position_embeddings, model_dim):
    # Pure-JAX reference mirroring the PyTorch buffer construction.
    pos = jnp.arange(max_position_embeddings, dtype=jnp.float32)[:, None]
    _2i = jnp.arange(0, model_dim, 2, dtype=jnp.float32)
    div = jnp.power(10000.0, _2i / model_dim)
    enc = jnp.zeros((max_position_embeddings, model_dim), jnp.float32)
    enc = enc.at[:, 0::2].set(jnp.sin(pos / div))
    enc = enc.at[:, 1::2].set(jnp.cos(pos / div))
    S = x.shape[1]
    return (x.astype(jnp.float32) + enc[:S][None, :, :]).astype(x.dtype)


if __name__ == "__main__":
    # Small synthetic config: max_position_embeddings=16, model_dim=32.
    MAX_POS = 16
    MODEL_DIM = 32
    key = jax.random.PRNGKey(0)
    k1, k2 = jax.random.split(key)

    # 1) Small batch -> streamed precomputed-table path (lane-dense folded to 128 lanes).
    x_small = jax.random.normal(k1, (2, 8, MODEL_DIM), dtype=jnp.float32)
    out_small = jax.block_until_ready(
        sinusoidal_positional_embedding(x_small, MAX_POS, MODEL_DIM))
    ref_small = _reference(x_small, MAX_POS, MODEL_DIM)
    assert out_small.shape == x_small.shape
    assert jnp.allclose(out_small, ref_small, atol=1e-5, rtol=1e-5), "small-batch mismatch"

    # 2) Larger batch -> in-kernel table build cached in VMEM scratch across batch steps.
    x_big = jax.random.normal(k2, (8, 8, MODEL_DIM), dtype=jnp.float32)
    out_big = jax.block_until_ready(
        sinusoidal_positional_embedding(x_big, MAX_POS, MODEL_DIM))
    ref_big = _reference(x_big, MAX_POS, MODEL_DIM)
    assert out_big.shape == x_big.shape
    assert jnp.allclose(out_big, ref_big, atol=1e-5, rtol=1e-5), "large-batch mismatch"

    print("KERNEL_OK")
</pallas_src>

<mosaic_0001>
module attributes {stable_mosaic.version = 11 : i64} {
  func.func @_add_kernel(%arg0: i32, %arg1: i32, %arg2: memref<1x2x128xf32, #tpu.memory_space<vmem>>, %arg3: memref<2x128xf32, #tpu.memory_space<vmem>>, %arg4: memref<1x2x128xf32, #tpu.memory_space<vmem>>) attributes {dimension_semantics = [#tpu.dimension_semantics<parallel>, #tpu.dimension_semantics<parallel>], iteration_bounds = array<i64: 1, 2>, scalar_prefetch = 0 : i64, scratch_operands = 0 : i64, tpu.core_type = #tpu.core_type<tc>, window_params = [{transform_indices = @transform_0, window_bounds = array<i64: 1, 2, 128>}, {transform_indices = @transform_1, window_bounds = array<i64: 2, 128>}, {transform_indices = @transform_2, window_bounds = array<i64: 1, 2, 128>}]} {
    %c0 = arith.constant 0 : index
    %c0_0 = arith.constant 0 : index
    %c0_1 = arith.constant 0 : index
    %0 = vector.load %arg2[%c0, %c0_0, %c0_1] : memref<1x2x128xf32, #tpu.memory_space<vmem>>, vector<1x2x128xf32>
    %1 = vector.shape_cast %0 : vector<1x2x128xf32> to vector<2x128xf32>
    %c0_2 = arith.constant 0 : index
    %c0_3 = arith.constant 0 : index
    %2 = vector.load %arg3[%c0_2, %c0_3] : memref<2x128xf32, #tpu.memory_space<vmem>>, vector<2x128xf32>
    %3 = arith.addf %1, %2 : vector<2x128xf32>
    %c0_4 = arith.constant 0 : index
    %c0_5 = arith.constant 0 : index
    %c0_6 = arith.constant 0 : index
    %4 = vector.load %arg4[%c0_4, %c0_5, %c0_6] : memref<1x2x128xf32, #tpu.memory_space<vmem>>, vector<1x2x128xf32>
    %5 = vector.shape_cast %4 : vector<1x2x128xf32> to vector<2x128xf32>
    %6 = vector.shape_cast %3 : vector<2x128xf32> to vector<1x2x128xf32>
    tpu.vector_store %arg4[%c0_4, %c0_5, %c0_6], %6 {strides = array<i32>} : memref<1x2x128xf32, #tpu.memory_space<vmem>>, vector<1x2x128xf32>,
    return
  }
  func.func @transform_0(%arg0: i32, %arg1: i32) -> (i32, i32, i32) {
    %c0_i32 = arith.constant 0 : i32
    %c0_i32_0 = arith.constant 0 : i32
    return %arg1, %arg0, %c0_i32 : i32, i32, i32
  }
  func.func @transform_1(%arg0: i32, %arg1: i32) -> (i32, i32) {
    %c0_i32 = arith.constant 0 : i32
    %c0_i32_0 = arith.constant 0 : i32
    return %arg0, %c0_i32 : i32, i32
  }
  func.func @transform_2(%arg0: i32, %arg1: i32) -> (i32, i32, i32) {
    %c0_i32 = arith.constant 0 : i32
    %c0_i32_0 = arith.constant 0 : i32
    return %arg1, %arg0, %c0_i32 : i32, i32, i32
  }
}

</mosaic_0001>

<bundles_post_ra>
// kernel: tpu_custom_call.1
= control target key start
LH: loop header
LB: loop body
LE: loop exit
PB: predicated region body
PF: predicated region fallthrough
CT: control target
= control target key end

     0   :  { %7 = vsyncpa [#allocation3], 0  ;;  %s714_s0 = inlined_call_operand.hbm [shape: f32[2,2,128], index: 0, kind: input, shape index: {}]   ;;  %s715_s1 = inlined_call_operand.hbm [shape: f32[2,128], index: 1, kind: input, shape index: {}]   ;;  %s716_s2 = inlined_call_operand.hbm [shape: f32[2,2,128], index: 2, kind: output, shape index: {}]  }
   0x1   :  { %9 = vsyncpa [#allocation3 + $0x1], 0 }
   0x2   :  { %10 = vsyncpa [#allocation6], 0 }
   0x3   :  { %11 = vsyncpa [#allocation4], 0 }
   0x4   :  { %13 = vsyncpa [#allocation4 + $0x1], 0  ;;  %s565_s9 = smov 0   ;;  %s567_s10 = smov 0  }
   0x5   :  { %s569_s11 = smov 0   ;;  %s571_s12 = smov 0  }
   0x6   :  { %s573_s13 = smov 0   ;;  %s575_s14 = smov 0  }
   0x7 LB: > { %s313_s15 = sadd.s32 4294967295, %s547_s14   ;;  %s314_s16 = sadd.s32 4294967294, %s547_s14   ;;  %s547_s14 = sphi %s575_s14, %s19_s14   ;;  %s543_s13 = sphi %s573_s13, %s728_s13   ;;  %s539_s12 = sphi %s571_s12, %s727_s12   ;;  %s535_s11 = sphi %s569_s11, %s726_s11   ;;  %s531_s10 = sphi %s567_s10, %s725_s10   ;;  %s527_s9 = sphi %s565_s9, %s724_s9  }
   0x8   : > { %p53_p0 = scmp.ne.s32.totalorder %s531_s10, %s527_s9  ;;  %p599_p1 = scmp.eq.s32.totalorder %s313_s15, 0 }
   0x9   : > { %p603_p2 = scmp.eq.s32.totalorder %s313_s15, 1  ;;  %p111_p3 = scmp.eq.s32.totalorder %s314_s16, 1 }
   0xa   : > { %p609_p4 = por %p599_p1, %p53_p0  ;;  %p315_p5 = scmp.ge.s32.totalorder %s547_s14, 1 }
   0xb   : > { %p614_p6 = por %p111_p3, %p53_p0  ;;  %p118_p7 = scmp.lt.s32.totalorder %s547_s14, 3 }
   0xc   : > { %s132_s23 = sshll.u32 %s715_s1, 4  ;;  %p317_p9 = scmp.ge.s32.totalorder %s547_s14, 2  ;;  %s133_s23 = int_to_ptr.hbm [resolvable:$true] %s132_s23 }
   0xd   : > { %p622_p8 = pnand %p315_p5, %p118_p7  ;;  %s549_s25 = smov [#allocation5]  }
   0xe   : > { %s134_s26 = sshll.u32 %s549_s25, 4  ;;  %s28_s27 = sadd.s32 1, %s543_s13  ;;  %s135_s26 = int_to_ptr.vmem [resolvable:$true] %s134_s26 }
   0xf   : > { %p336_p10 = pneg %p622_p8  ;;  %p29_p12 = scmp.ge.s32.totalorder %s28_s27, 2 }
  0x10   : > { %s40_s28 = sadd.s32 1, %s535_s11  ;;  %p47_p13 = scmp.ne.s32.totalorder %s535_s11, %s531_s10 }
  0x11   : > { %p337_p11 = pnand %p336_p10, %p599_p1  ;;  %p48_p0 = scmp.eq.s32.totalorder %s547_s14, 0 }
  0x12   : > { %s730_s27 = smov (%p29_p12, %s28_s27), 0  ;;  %p644_p5 = por %p603_p2, %p47_p13 }
  0x13   : > { %339 = dma.hbm_to_vmem [thread:$0]  (!%p337_p11), %s133_s23, 32, %s135_s26, [#allocation6]  }
  0x14   : > { %p638_p3 = por %p48_p0, %p47_p13  ;;  %s35_s3 = ssub.s32 %s543_s13, %s730_s27 }
  0x15   : > { %p349_p7 = scmp.lt.s32.totalorder %s547_s14, 2  ;;  %p38_p10 = scmp.eq.s32.totalorder %s35_s3, 0 }
  0x16   : > { %s145_s4 = sand.u32 1, %s535_s11   ;;  %s319_s7 = sshll.u32 %s543_s13, 1 }
  0x17   : > { %s318_s5 = sshll.u32 %s145_s4, 1  ;;  %s154_s16 = scalar_lea.hbm %s714_s0, %s319_s7 }
  0x18   : > { %s653_s6 = scalar_select %p38_p10, %s535_s11, %s40_s28  }
  0x19   : > { %s149_s21 = scalar_lea.vmem [#allocation2], %s318_s5  ;;  %s156_s18 = sshll.u32 %s154_s16, 4  ;;  %s157_s18 = int_to_ptr.hbm [resolvable:$true] %s156_s18 }
  0x1a   : > { %s158_s22 = sshll.u32 %s149_s21, 4  ;;  %p341_p2 = pnand %p349_p7, %p638_p3  ;;  %s159_s22 = int_to_ptr.vmem [resolvable:$true] %s158_s22 }
  0x1b   : > { %s146_s23 = scalar_lea.sflag [#allocation3], %s145_s4  ;;  %167 = sbr.rel (%p622_p8) target bundleno = 50 (0x32), region = 28 }
  0x1c   : > { %343 = dma.hbm_to_vmem [thread:$0]  (!%p341_p2), %s157_s18, 32, %s159_s22, %s146_s23  }
  0x1d   : > { %s664_s25 = sand.u32 (!%p622_p8), 1, %s531_s10  }
  0x1e   : > { %s321_s26 = sshll.u32 (!%p622_p8), %s664_s25, 1  ;;  %s170_s28 = scalar_lea.sflag (!%p622_p8), [#allocation3], %s664_s25 }
  0x1f   : > { %s173_s3 = scalar_lea.vmem (!%p622_p8), [#allocation2], %s321_s26 }
  0x20   : > { %514 = dma.done.wait (%p609_p4), %s170_s28, 32  }
  0x21   : > { %516 = vsyncadd (%p609_p4), %s170_s28, 4294967264 }
  0x22   : > { %518 = dma.done.wait (%p599_p1), [#allocation6], 32  }
  0x23   : > { %520 = vsyncadd (%p599_p1), [#allocation6], 4294967264  ;;  %s325_s24 = sshll.u32 %s539_s12, 1  ;;  %s199_s7 = scalar_lea.vmem [#allocation7], %s321_s26  ;;  %v200_v0 = vld [vmem:[%s173_s3] sm:$0x3] }
  0x24   : > { %s216_s5 = scalar_lea.hbm %s716_s2, %s325_s24  ;;  %s218_s8 = sshll.u32 %s199_s7, 4  ;;  %v201_v1 = vld [vmem:[#allocation5] sm:$0x3]  ;;  %s219_s8 = int_to_ptr.vmem [resolvable:$true] %s218_s8 }
  0x25   : > { %s220_s15 = sshll.u32 %s216_s5, 4  ;;  %v202_v2 = vadd.f32 %v201_v1, %v200_v0  ;;  %s205_s19 = scalar_lea.sflag [#allocation4], %s664_s25  ;;  %s221_s15 = int_to_ptr.hbm [resolvable:$true] %s220_s15 }
  0x26   : > { %s475_s17 = sshra.s32 %s221_s15, 4  ;;  %s481_s22 = scalar_lea.hbm %s716_s2, 4  ;;  %s476_s17 = int_to_ptr.hbm [resolvable:$true] %s475_s17 }
  0x27   : > { %203 = vst [vmem:[%s199_s7] sm:$0x3] %v202_v2  ;;  %s477_s16 = scalar_lea.hbm %s476_s17, 2  ;;  %p482_p11 = scmp.lt.s32.totalorder %s476_s17, %s716_s2 }
  0x28   : > { %p478_p1 = scmp.ne.s32.totalorder %s476_s17, %s477_s16  ;;  %p483_p12 = scmp.lt.s32.totalorder %s481_s22, %s477_s16 }
  0x2a   : > { %p479_p4 = pnand %p478_p1, %p644_p5  ;;  %p484_p13 = por %p483_p12, %p482_p11 }
  0x2c   : > { %p480_p8 = pneg %p479_p4 }
  0x2e   : > { %p485_p0 = pnand %p484_p13, %p480_p8 }
  0x30   : > { %488 = shalt.err (!%p485_p0)
}
  0x31   : > { %334 = dma.vmem_to_hbm [thread:$0]  (%p644_p5), %s219_s8, 32, %s221_s15, %s205_s19  }
  0x32 PF: > { %s232_s25 = sand.u32 1, %s527_s9   ;;  %p345_p3 = pnand %p317_p9, %p614_p6 }
  0x33   : > { %s233_s26 = scalar_lea.sflag [#allocation4], %s232_s25 }
  0x34   : > { %p346_p7 = pneg %p345_p3 }
  0x36   : > { %522 = dma.done.wait (%p346_p7), %s233_s26, 32  }
  0x37   : > { %524 = vsyncadd (%p346_p7), %s233_s26, 4294967264  ;;  %s19_s14 = sadd.s32 1, %s547_s14   ;;  %s724_s9 = smov %s531_s10 }
  0x38   : > { %p16_p10 = scmp.ge.s32.totalorder %s19_s14, 4   ;;  %s725_s10 = smov %s535_s11 }
  0x39   : > { %s726_s11 = smov %s653_s6  ;;  %s727_s12 = smov %s543_s13 }
  0x3a   : > { %s728_s13 = smov %s730_s27  ;;  %18 = sbr.rel (!%p16_p10) target bundleno = 7 (0x7), region = 78 }
  0x3f   :  { %239 = vsyncpa [#allocation3], 1 }
  0x40   :  { %241 = vsyncpa [#allocation3 + $0x1], 1 }
  0x41   :  { %242 = vsyncpa [#allocation6], 1 }
  0x42   :  { %243 = vsyncpa [#allocation4], 1 }
  0x43   :  { %245 = vsyncpa [#allocation4 + $0x1], 1 }

</bundles_post_ra>
